<compile_context>
chip_gen: v7x
topology: tpu7x:2x2x1
jax: 0.10.0
libtpu: 0.0.40
codegen_flags: <defaults>
</compile_context>

<pallas_src>
import functools

import jax
import jax.numpy as jnp
from jax import lax
from jax.experimental import pallas as pl
from jax.experimental.pallas import tpu as pltpu

EPS = 1e-5


# ------------------------------ small helpers ------------------------------ #

def _round_up(v, m):
    return (v + m - 1) // m * m


def _pad_rows(a, rows):
    return jnp.pad(a, ((0, rows - a.shape[0]), (0, 0)))


def _pad_cols(a, cols):
    return jnp.pad(a, ((0, 0), (0, cols - a.shape[1])))


def _im2col_3x3(xp, h_out, w_out, stride):
    """xp: zero-padded NHWC image. Returns (N*h_out*w_out, 9*C)."""
    n, _, _, c = xp.shape
    taps = []
    for kh in range(3):
        for kw in range(3):
            taps.append(
                xp[:, kh:kh + stride * (h_out - 1) + 1:stride,
                      kw:kw + stride * (w_out - 1) + 1:stride, :])
    cols = jnp.concatenate(taps, axis=-1)              # (N, Ho, Wo, 9*C)
    return cols.reshape(n * h_out * w_out, 9 * c)


def _w3x3_to_2d(w):
    """(Cout, Cin, 3, 3) -> (9*Cin, Cout), matching im2col tap/channel order."""
    co, ci = w.shape[0], w.shape[1]
    return jnp.transpose(w, (2, 3, 1, 0)).reshape(9 * ci, co)


# ----------------------------- Pallas kernels ------------------------------ #

def _conv_stats_kernel(*refs, has_proj):
    """Per row tile: y = cols @ w (bf16 -> f32 acc), accumulate per-channel
    sum / sumsq across tiles into resident (1, Cp) outputs.  Optionally also
    computes the fused 1x1 shortcut projection ysc = xs @ wsc and its stats."""
    if has_proj:
        (cols_ref, xs_ref, w_ref, wsc_ref,
         y_ref, ysc_ref, s1_ref, q1_ref, ss_ref, qs_ref) = refs
    else:
        cols_ref, w_ref, y_ref, s1_ref, q1_ref = refs

    @pl.when(pl.program_id(0) == 0)
    def _init():
        s1_ref[...] = jnp.zeros_like(s1_ref)
        q1_ref[...] = jnp.zeros_like(q1_ref)
        if has_proj:
            ss_ref[...] = jnp.zeros_like(ss_ref)
            qs_ref[...] = jnp.zeros_like(qs_ref)

    y = jnp.dot(cols_ref[...], w_ref[...], preferred_element_type=jnp.float32)
    y_ref[...] = y
    s1_ref[...] += jnp.sum(y, axis=0, keepdims=True)
    q1_ref[...] += jnp.sum(y * y, axis=0, keepdims=True)

    if has_proj:
        ysc = jnp.dot(xs_ref[...], wsc_ref[...],
                      preferred_element_type=jnp.float32)
        ysc_ref[...] = ysc
        ss_ref[...] += jnp.sum(ysc, axis=0, keepdims=True)
        qs_ref[...] += jnp.sum(ysc * ysc, axis=0, keepdims=True)


def _bn_act_kernel(y_ref, s_ref, q_ref, g_ref, b_ref, o_ref, *,
                   use_bn, relu, inv_count):
    """o = [relu]( BN(y) )  using the pre-reduced sum / sumsq."""
    y = y_ref[...]
    if use_bn:
        mean = s_ref[...] * inv_count
        var = jnp.maximum(q_ref[...] * inv_count - mean * mean, 0.0)
        y = (y - mean) * (lax.rsqrt(var + EPS) * g_ref[...]) + b_ref[...]
    if relu:
        y = jnp.maximum(y, 0.0)
    o_ref[...] = y.astype(o_ref.dtype)


def _final_kernel(y_ref, sc_ref, s2_ref, q2_ref, g2_ref, b2_ref,
                  ss_ref, qs_ref, gs_ref, bs_ref, o_ref, *,
                  use_bn, bn_shortcut, inv_count):
    """o = relu( BN(y2) + [BN](shortcut) )."""
    y = y_ref[...]
    if use_bn:
        mean = s2_ref[...] * inv_count
        var = jnp.maximum(q2_ref[...] * inv_count - mean * mean, 0.0)
        y = (y - mean) * (lax.rsqrt(var + EPS) * g2_ref[...]) + b2_ref[...]
    sc = sc_ref[...]
    if bn_shortcut:
        mean = ss_ref[...] * inv_count
        var = jnp.maximum(qs_ref[...] * inv_count - mean * mean, 0.0)
        sc = (sc - mean) * (lax.rsqrt(var + EPS) * gs_ref[...]) + bs_ref[...]
    o_ref[...] = jnp.maximum(y + sc, 0.0).astype(o_ref.dtype)


# ----------------------------- pallas_call glue ----------------------------- #

def _conv_stats_call(cols, w2d, xs=None, wsc=None, *, tile_r):
    has_proj = xs is not None
    Rp, K = cols.shape
    Cop = w2d.shape[1]
    row = lambda i: (i, 0)     # row-tiled operands
    res = lambda i: (0, 0)     # resident operands (fetched once)

    if has_proj:
        args = (cols, xs, w2d, wsc)
        in_specs = [pl.BlockSpec((tile_r, K), row),
                    pl.BlockSpec((tile_r, xs.shape[1]), row),
                    pl.BlockSpec((K, Cop), res),
                    pl.BlockSpec((wsc.shape[0], Cop), res)]
        out_shape = (jax.ShapeDtypeStruct((Rp, Cop), jnp.float32),
                     jax.ShapeDtypeStruct((Rp, Cop), jnp.float32),
                     jax.ShapeDtypeStruct((1, Cop), jnp.float32),
                     jax.ShapeDtypeStruct((1, Cop), jnp.float32),
                     jax.ShapeDtypeStruct((1, Cop), jnp.float32),
                     jax.ShapeDtypeStruct((1, Cop), jnp.float32))
        out_specs = (pl.BlockSpec((tile_r, Cop), row),
                     pl.BlockSpec((tile_r, Cop), row),
                     pl.BlockSpec((1, Cop), res),
                     pl.BlockSpec((1, Cop), res),
                     pl.BlockSpec((1, Cop), res),
                     pl.BlockSpec((1, Cop), res))
    else:
        args = (cols, w2d)
        in_specs = [pl.BlockSpec((tile_r, K), row),
                    pl.BlockSpec((K, Cop), res)]
        out_shape = (jax.ShapeDtypeStruct((Rp, Cop), jnp.float32),
                     jax.ShapeDtypeStruct((1, Cop), jnp.float32),
                     jax.ShapeDtypeStruct((1, Cop), jnp.float32))
        out_specs = (pl.BlockSpec((tile_r, Cop), row),
                     pl.BlockSpec((1, Cop), res),
                     pl.BlockSpec((1, Cop), res))

    kernel = functools.partial(_conv_stats_kernel, has_proj=has_proj)
    return pl.pallas_call(
        kernel,
        out_shape=out_shape,
        grid=(Rp // tile_r,),
        in_specs=in_specs,
        out_specs=out_specs,
        compiler_params=pltpu.CompilerParams(
            dimension_semantics=("arbitrary",)),   # stats accumulate over tiles
    )(*args)


def _bn_act_call(y, s, q, gamma, beta, *, use_bn, relu, inv_count, tile_r,
                 out_dtype):
    Rp, Cop = y.shape
    row = lambda i: (i, 0)
    res = lambda i: (0, 0)
    kernel = functools.partial(_bn_act_kernel, use_bn=use_bn, relu=relu,
                               inv_count=inv_count)
    return pl.pallas_call(
        kernel,
        out_shape=jax.ShapeDtypeStruct((Rp, Cop), out_dtype),
        grid=(Rp // tile_r,),
        in_specs=[pl.BlockSpec((tile_r, Cop), row),
                  pl.BlockSpec((1, Cop), res),
                  pl.BlockSpec((1, Cop), res),
                  pl.BlockSpec((1, Cop), res),
                  pl.BlockSpec((1, Cop), res)],
        out_specs=pl.BlockSpec((tile_r, Cop), row),
        compiler_params=pltpu.CompilerParams(
            dimension_semantics=("parallel",)),
    )(y, s, q, gamma, beta)


def _final_call(y2, sc, s2, q2, g2, b2, ssc, qsc, gsc, bsc, *,
                use_bn, bn_shortcut, inv_count, tile_r):
    Rp, Cop = y2.shape
    row = lambda i: (i, 0)
    res = lambda i: (0, 0)
    kernel = functools.partial(_final_kernel, use_bn=use_bn,
                               bn_shortcut=bn_shortcut, inv_count=inv_count)
    return pl.pallas_call(
        kernel,
        out_shape=jax.ShapeDtypeStruct((Rp, Cop), jnp.float32),
        grid=(Rp // tile_r,),
        in_specs=[pl.BlockSpec((tile_r, Cop), row),
                  pl.BlockSpec((tile_r, Cop), row),
                  pl.BlockSpec((1, Cop), res),
                  pl.BlockSpec((1, Cop), res),
                  pl.BlockSpec((1, Cop), res),
                  pl.BlockSpec((1, Cop), res),
                  pl.BlockSpec((1, Cop), res),
                  pl.BlockSpec((1, Cop), res),
                  pl.BlockSpec((1, Cop), res),
                  pl.BlockSpec((1, Cop), res)],
        out_specs=pl.BlockSpec((tile_r, Cop), row),
        compiler_params=pltpu.CompilerParams(
            dimension_semantics=("parallel",)),
    )(y2, sc, s2, q2, g2, b2, ssc, qsc, gsc, bsc)


# ------------------------------- forward pass ------------------------------- #

def basic_block_forward(x_nchw, params, *, stride, use_batch_norm,
                        block_rows=512):
    """BasicBlock forward.  block_rows: row-tile size (multiple of 16);
    default 512 rows keeps double-buffered tiles well under v7x's 64 MiB VMEM
    for typical ResNet widths."""
    N, Cin, H, W = x_nchw.shape
    Cout = params["w1"].shape[0]
    has_proj = (stride != 1) or (Cin != Cout)

    H1 = (H + 2 - 3) // stride + 1
    W1 = (W + 2 - 3) // stride + 1
    R = N * H1 * W1
    Cop = _round_up(Cout, 128)                      # lane-dense output width
    tile_r = max(16, min(_round_up(block_rows, 16), _round_up(R, 16)))
    Rp = _round_up(R, tile_r)
    inv_count = 1.0 / float(R)                      # BN divides by the real R

    x = jnp.transpose(x_nchw, (0, 2, 3, 1)).astype(jnp.float32)   # NHWC f32
    xb = x.astype(jnp.bfloat16)                                    # MXU operand

    ones_c = jnp.ones((Cout,), jnp.float32)
    zeros_c = jnp.zeros((Cout,), jnp.float32)

    def vec(name, default):
        return _pad_cols(jnp.asarray(params.get(name, default),
                                     jnp.float32).reshape(1, Cout), Cop)

    g1, b1 = vec("gamma1", ones_c), vec("beta1", zeros_c)
    g2, b2 = vec("gamma2", ones_c), vec("beta2", zeros_c)

    # ---- conv1 (3x3, stride, pad=1) + fused 1x1 shortcut projection --------
    xp = jnp.pad(xb, ((0, 0), (1, 1), (1, 1), (0, 0)))
    cols1 = _pad_rows(_im2col_3x3(xp, H1, W1, stride), Rp)        # (Rp, 9*Cin)
    w1 = _pad_cols(_w3x3_to_2d(params["w1"]).astype(jnp.bfloat16), Cop)

    if has_proj:
        xs = _pad_rows(
            xb[:, ::stride, ::stride, :][:, :H1, :W1, :].reshape(R, Cin), Rp)
        wsc = _pad_cols(
            jnp.transpose(params["wsc"], (2, 3, 1, 0)).reshape(Cin, Cout)
            .astype(jnp.bfloat16), Cop)
        y1_raw, ysc_raw, s1, q1, ssc, qsc = _conv_stats_call(
            cols1, w1, xs, wsc, tile_r=tile_r)
    else:
        y1_raw, s1, q1 = _conv_stats_call(cols1, w1, tile_r=tile_r)

    # ---- bn1 (apply pass) + relu, written as bf16 for the conv2 matmul -----
    y1n = _bn_act_call(y1_raw, s1, q1, g1, b1, use_bn=use_batch_norm,
                       relu=True, inv_count=inv_count, tile_r=tile_r,
                       out_dtype=jnp.bfloat16)                    # (Rp, Cop)

    # ---- conv2 (3x3, stride 1, pad=1) --------------------------------------
    y1_img = y1n[:R, :Cout].reshape(N, H1, W1, Cout)
    y1p = jnp.pad(y1_img, ((0, 0), (1, 1), (1, 1), (0, 0)))
    cols2 = _pad_rows(_im2col_3x3(y1p, H1, W1, 1), Rp)            # (Rp, 9*Cout)
    w2 = _pad_cols(_w3x3_to_2d(params["w2"]).astype(jnp.bfloat16), Cop)
    y2_raw, s2, q2 = _conv_stats_call(cols2, w2, tile_r=tile_r)

    # ---- bn2 (apply) + shortcut (+BN) add + relu ----------------------------
    if has_proj:
        sc = ysc_raw
        gsc, bsc = vec("gammasc", ones_c), vec("betasc", zeros_c)
        bn_shortcut = use_batch_norm
    else:
        sc = _pad_rows(_pad_cols(
            x[:, ::stride, ::stride, :][:, :H1, :W1, :].reshape(R, Cin), Cop),
            Rp)
        dummy = jnp.zeros((1, Cop), jnp.float32)
        ssc = qsc = gsc = bsc = dummy
        bn_shortcut = False

    out = _final_call(y2_raw, sc, s2, q2, g2, b2, ssc, qsc, gsc, bsc,
                      use_bn=use_batch_norm, bn_shortcut=bn_shortcut,
                      inv_count=inv_count, tile_r=tile_r)          # (Rp, Cop)

    out = out[:R, :Cout].reshape(N, H1, W1, Cout)
    return jnp.transpose(out, (0, 3, 1, 2))                        # -> NCHW


# ----------------------- pure-JAX reference (check) ------------------------ #

def reference_forward(x, params, *, stride, use_batch_norm):
    # Mirrors the kernel's bf16 MXU operands (inputs/weights rounded to bf16,
    # f32 accumulation) so the comparison stays tight.
    rb = lambda a: a.astype(jnp.bfloat16).astype(jnp.float32)

    def conv(x_, w, s, p):
        return lax.conv_general_dilated(
            rb(x_), rb(w), (s, s), [(p, p), (p, p)],
            dimension_numbers=("NCHW", "OIHW", "NCHW"),
            precision=lax.Precision.HIGHEST)

    def bn(y, g, b):
        m = y.mean(axis=(0, 2, 3), keepdims=True)
        v = jnp.square(y - m).mean(axis=(0, 2, 3), keepdims=True)
        return (y - m) * lax.rsqrt(v + EPS) * g.reshape(1, -1, 1, 1) \
            + b.reshape(1, -1, 1, 1)

    Cin = x.shape[1]
    Cout = params["w1"].shape[0]
    out = conv(x, params["w1"], stride, 1)
    if use_batch_norm:
        out = bn(out, params["gamma1"], params["beta1"])
    out = jnp.maximum(out, 0.0)
    out = conv(out, params["w2"], 1, 1)
    if use_batch_norm:
        out = bn(out, params["gamma2"], params["beta2"])
    if stride != 1 or Cin != Cout:
        sc = conv(x, params["wsc"], stride, 0)
        if use_batch_norm:
            sc = bn(sc, params["gammasc"], params["betasc"])
    else:
        sc = x
    return jnp.maximum(out + sc, 0.0)


# ---------------------------------- main ----------------------------------- #

if __name__ == "__main__":
    ks = jax.random.split(jax.random.PRNGKey(0), 13)

    # ---- config A: stride-2 projection shortcut + BatchNorm ----------------
    N, Cin, Cout, H, W, stride = 2, 4, 8, 16, 16, 2
    params_a = {
        "w1":  0.1 * jax.random.normal(ks[0], (Cout, Cin, 3, 3), jnp.float32),
        "w2":  0.1 * jax.random.normal(ks[1], (Cout, Cout, 3, 3), jnp.float32),
        "wsc": 0.1 * jax.random.normal(ks[2], (Cout, Cin, 1, 1), jnp.float32),
        "gamma1": 1.0 + 0.1 * jax.random.normal(ks[3], (Cout,), jnp.float32),
        "beta1":  0.1 * jax.random.normal(ks[4], (Cout,), jnp.float32),
        "gamma2": 1.0 + 0.1 * jax.random.normal(ks[5], (Cout,), jnp.float32),
        "beta2":  0.1 * jax.random.normal(ks[6], (Cout,), jnp.float32),
        "gammasc": 1.0 + 0.1 * jax.random.normal(ks[7], (Cout,), jnp.float32),
        "betasc":  0.1 * jax.random.normal(ks[8], (Cout,), jnp.float32),
    }
    x_a = jax.random.normal(ks[9], (N, Cin, H, W), jnp.float32)

    # block_rows=64 forces a multi-tile grid (R=128 -> 2 tiles) so the
    # cross-tile BN accumulation path is exercised at toy size.
    out_a = jax.block_until_ready(
        basic_block_forward(x_a, params_a, stride=stride,
                            use_batch_norm=True, block_rows=64))
    ref_a = jax.block_until_ready(
        reference_forward(x_a, params_a, stride=stride, use_batch_norm=True))
    assert out_a.shape == ref_a.shape == (N, Cout, H // stride, W // stride)
    err_a = float(jnp.max(jnp.abs(out_a - ref_a)))
    assert jnp.allclose(out_a, ref_a, atol=2e-2, rtol=2e-2), err_a

    # ---- config B: identity shortcut, no BatchNorm -------------------------
    N2, C2, H2, W2 = 2, 8, 8, 8
    params_b = {
        "w1": 0.1 * jax.random.normal(ks[10], (C2, C2, 3, 3), jnp.float32),
        "w2": 0.1 * jax.random.normal(ks[11], (C2, C2, 3, 3), jnp.float32),
    }
    x_b = jax.random.normal(ks[12], (N2, C2, H2, W2), jnp.float32)
    out_b = jax.block_until_ready(
        basic_block_forward(x_b, params_b, stride=1,
                            use_batch_norm=False, block_rows=64))
    ref_b = jax.block_until_ready(
        reference_forward(x_b, params_b, stride=1, use_batch_norm=False))
    assert out_b.shape == ref_b.shape == (N2, C2, H2, W2)
    err_b = float(jnp.max(jnp.abs(out_b - ref_b)))
    assert jnp.allclose(out_b, ref_b, atol=2e-2, rtol=2e-2), err_b

    print("KERNEL_OK")
</pallas_src>

<mosaic_0001>
module attributes {stable_mosaic.version = 11 : i64} {
  func.func @_conv_stats_kernel(%arg0: i32, %arg1: memref<64x36xbf16, #tpu.memory_space<vmem>>, %arg2: memref<64x4xbf16, #tpu.memory_space<vmem>>, %arg3: memref<36x128xbf16, #tpu.memory_space<vmem>>, %arg4: memref<4x128xbf16, #tpu.memory_space<vmem>>, %arg5: memref<64x128xf32, #tpu.memory_space<vmem>>, %arg6: memref<64x128xf32, #tpu.memory_space<vmem>>, %arg7: memref<1x128xf32, #tpu.memory_space<vmem>>, %arg8: memref<1x128xf32, #tpu.memory_space<vmem>>, %arg9: memref<1x128xf32, #tpu.memory_space<vmem>>, %arg10: memref<1x128xf32, #tpu.memory_space<vmem>>) attributes {dimension_semantics = [#tpu.dimension_semantics<arbitrary>], iteration_bounds = array<i64: 2>, scalar_prefetch = 0 : i64, scratch_operands = 0 : i64, tpu.core_type = #tpu.core_type<tc>, window_params = [{transform_indices = @transform_0, window_bounds = array<i64: 64, 36>}, {transform_indices = @transform_1, window_bounds = array<i64: 64, 4>}, {pipeline_mode = #tpu.pipeline_mode<synchronous>, transform_indices = @transform_2, window_bounds = array<i64: 36, 128>}, {pipeline_mode = #tpu.pipeline_mode<synchronous>, transform_indices = @transform_3, window_bounds = array<i64: 4, 128>}, {transform_indices = @transform_4, window_bounds = array<i64: 64, 128>}, {transform_indices = @transform_5, window_bounds = array<i64: 64, 128>}, {pipeline_mode = #tpu.pipeline_mode<synchronous>, transform_indices = @transform_6, window_bounds = array<i64: 1, 128>}, {pipeline_mode = #tpu.pipeline_mode<synchronous>, transform_indices = @transform_7, window_bounds = array<i64: 1, 128>}, {pipeline_mode = #tpu.pipeline_mode<synchronous>, transform_indices = @transform_8, window_bounds = array<i64: 1, 128>}, {pipeline_mode = #tpu.pipeline_mode<synchronous>, transform_indices = @transform_9, window_bounds = array<i64: 1, 128>}]} {
    %c0_i32 = arith.constant 0 : i32
    %0 = arith.cmpi eq, %arg0, %c0_i32 : i32
    %1 = arith.extui %0 : i1 to i32
    %c0_i32_0 = arith.constant 0 : i32
    %2 = arith.cmpi ne, %1, %c0_i32_0 : i32
    scf.if %2 {
      %cst_33 = arith.constant 0.000000e+00 : f32
      %33 = vector.broadcast %cst_33 : f32 to vector<1x128xf32>
      %c0_34 = arith.constant 0 : index
      %c0_35 = arith.constant 0 : index
      %34 = vector.load %arg7[%c0_34, %c0_35] : memref<1x128xf32, #tpu.memory_space<vmem>>, vector<1x128xf32>
      tpu.vector_store %arg7[%c0_34, %c0_35], %33 {strides = array<i32>} : memref<1x128xf32, #tpu.memory_space<vmem>>, vector<1x128xf32>,
      %cst_36 = arith.constant 0.000000e+00 : f32
      %35 = vector.broadcast %cst_36 : f32 to vector<1x128xf32>
      %c0_37 = arith.constant 0 : index
      %c0_38 = arith.constant 0 : index
      %36 = vector.load %arg8[%c0_37, %c0_38] : memref<1x128xf32, #tpu.memory_space<vmem>>, vector<1x128xf32>
      tpu.vector_store %arg8[%c0_37, %c0_38], %35 {strides = array<i32>} : memref<1x128xf32, #tpu.memory_space<vmem>>, vector<1x128xf32>,
      %cst_39 = arith.constant 0.000000e+00 : f32
      %37 = vector.broadcast %cst_39 : f32 to vector<1x128xf32>
      %c0_40 = arith.constant 0 : index
      %c0_41 = arith.constant 0 : index
      %38 = vector.load %arg9[%c0_40, %c0_41] : memref<1x128xf32, #tpu.memory_space<vmem>>, vector<1x128xf32>
      tpu.vector_store %arg9[%c0_40, %c0_41], %37 {strides = array<i32>} : memref<1x128xf32, #tpu.memory_space<vmem>>, vector<1x128xf32>,
      %cst_42 = arith.constant 0.000000e+00 : f32
      %39 = vector.broadcast %cst_42 : f32 to vector<1x128xf32>
      %c0_43 = arith.constant 0 : index
      %c0_44 = arith.constant 0 : index
      %40 = vector.load %arg10[%c0_43, %c0_44] : memref<1x128xf32, #tpu.memory_space<vmem>>, vector<1x128xf32>
      tpu.vector_store %arg10[%c0_43, %c0_44], %39 {strides = array<i32>} : memref<1x128xf32, #tpu.memory_space<vmem>>, vector<1x128xf32>,
    } else {
    }
    %c0 = arith.constant 0 : index
    %c0_1 = arith.constant 0 : index
    %3 = vector.load %arg1[%c0, %c0_1] : memref<64x36xbf16, #tpu.memory_space<vmem>>, vector<64x36xbf16>
    %c0_2 = arith.constant 0 : index
    %c0_3 = arith.constant 0 : index
    %4 = vector.load %arg3[%c0_2, %c0_3] : memref<36x128xbf16, #tpu.memory_space<vmem>>, vector<36x128xbf16>
    %cst = arith.constant dense<0.000000e+00> : vector<64x128xf32>
    %5 = tpu.matmul %3, %4, %cst {dimension_numbers = #tpu.dot_dimension_numbers<[1], [0], [0], [1], [0, 0, 1, 1], [], []>} : vector<64x36xbf16>, vector<36x128xbf16>, vector<64x128xf32> -> vector<64x128xf32>
    %c0_4 = arith.constant 0 : index
    %c0_5 = arith.constant 0 : index
    %6 = vector.load %arg5[%c0_4, %c0_5] : memref<64x128xf32, #tpu.memory_space<vmem>>, vector<64x128xf32>
    tpu.vector_store %arg5[%c0_4, %c0_5], %5 {strides = array<i32>} : memref<64x128xf32, #tpu.memory_space<vmem>>, vector<64x128xf32>,
    %c0_6 = arith.constant 0 : index
    %c0_7 = arith.constant 0 : index
    %7 = vector.load %arg7[%c0_6, %c0_7] : memref<1x128xf32, #tpu.memory_space<vmem>>, vector<1x128xf32>
    %cst_8 = arith.constant dense<0.000000e+00> : vector<128xf32>
    %8 = vector.multi_reduction <add>, %5, %cst_8 [0] : vector<64x128xf32> to vector<128xf32>
    %9 = vector.shape_cast %8 : vector<128xf32> to vector<1x128xf32>
    %10 = arith.addf %7, %9 : vector<1x128xf32>
    %c0_9 = arith.constant 0 : index
    %c0_10 = arith.constant 0 : index
    %11 = vector.load %arg7[%c0_9, %c0_10] : memref<1x128xf32, #tpu.memory_space<vmem>>, vector<1x128xf32>
    tpu.vector_store %arg7[%c0_9, %c0_10], %10 {strides = array<i32>} : memref<1x128xf32, #tpu.memory_space<vmem>>, vector<1x128xf32>,
    %c0_11 = arith.constant 0 : index
    %c0_12 = arith.constant 0 : index
    %12 = vector.load %arg8[%c0_11, %c0_12] : memref<1x128xf32, #tpu.memory_space<vmem>>, vector<1x128xf32>
    %13 = arith.mulf %5, %5 : vector<64x128xf32>
    %cst_13 = arith.constant dense<0.000000e+00> : vector<128xf32>
    %14 = vector.multi_reduction <add>, %13, %cst_13 [0] : vector<64x128xf32> to vector<128xf32>
    %15 = vector.shape_cast %14 : vector<128xf32> to vector<1x128xf32>
    %16 = arith.addf %12, %15 : vector<1x128xf32>
    %c0_14 = arith.constant 0 : index
    %c0_15 = arith.constant 0 : index
    %17 = vector.load %arg8[%c0_14, %c0_15] : memref<1x128xf32, #tpu.memory_space<vmem>>, vector<1x128xf32>
    tpu.vector_store %arg8[%c0_14, %c0_15], %16 {strides = array<i32>} : memref<1x128xf32, #tpu.memory_space<vmem>>, vector<1x128xf32>,
    %c0_16 = arith.constant 0 : index
    %c0_17 = arith.constant 0 : index
    %18 = vector.load %arg2[%c0_16, %c0_17] : memref<64x4xbf16, #tpu.memory_space<vmem>>, vector<64x4xbf16>
    %c0_18 = arith.constant 0 : index
    %c0_19 = arith.constant 0 : index
    %19 = vector.load %arg4[%c0_18, %c0_19] : memref<4x128xbf16, #tpu.memory_space<vmem>>, vector<4x128xbf16>
    %cst_20 = arith.constant dense<0.000000e+00> : vector<64x128xf32>
    %20 = tpu.matmul %18, %19, %cst_20 {dimension_numbers = #tpu.dot_dimension_numbers<[1], [0], [0], [1], [0, 0, 1, 1], [], []>} : vector<64x4xbf16>, vector<4x128xbf16>, vector<64x128xf32> -> vector<64x128xf32>
    %c0_21 = arith.constant 0 : index
    %c0_22 = arith.constant 0 : index
    %21 = vector.load %arg6[%c0_21, %c0_22] : memref<64x128xf32, #tpu.memory_space<vmem>>, vector<64x128xf32>
    tpu.vector_store %arg6[%c0_21, %c0_22], %20 {strides = array<i32>} : memref<64x128xf32, #tpu.memory_space<vmem>>, vector<64x128xf32>,
    %c0_23 = arith.constant 0 : index
    %c0_24 = arith.constant 0 : index
    %22 = vector.load %arg9[%c0_23, %c0_24] : memref<1x128xf32, #tpu.memory_space<vmem>>, vector<1x128xf32>
    %cst_25 = arith.constant dense<0.000000e+00> : vector<128xf32>
    %23 = vector.multi_reduction <add>, %20, %cst_25 [0] : vector<64x128xf32> to vector<128xf32>
    %24 = vector.shape_cast %23 : vector<128xf32> to vector<1x128xf32>
    %25 = arith.addf %22, %24 : vector<1x128xf32>
    %c0_26 = arith.constant 0 : index
    %c0_27 = arith.constant 0 : index
    %26 = vector.load %arg9[%c0_26, %c0_27] : memref<1x128xf32, #tpu.memory_space<vmem>>, vector<1x128xf32>
    tpu.vector_store %arg9[%c0_26, %c0_27], %25 {strides = array<i32>} : memref<1x128xf32, #tpu.memory_space<vmem>>, vector<1x128xf32>,
    %c0_28 = arith.constant 0 : index
    %c0_29 = arith.constant 0 : index
    %27 = vector.load %arg10[%c0_28, %c0_29] : memref<1x128xf32, #tpu.memory_space<vmem>>, vector<1x128xf32>
    %28 = arith.mulf %20, %20 : vector<64x128xf32>
    %cst_30 = arith.constant dense<0.000000e+00> : vector<128xf32>
    %29 = vector.multi_reduction <add>, %28, %cst_30 [0] : vector<64x128xf32> to vector<128xf32>
    %30 = vector.shape_cast %29 : vector<128xf32> to vector<1x128xf32>
    %31 = arith.addf %27, %30 : vector<1x128xf32>
    %c0_31 = arith.constant 0 : index
    %c0_32 = arith.constant 0 : index
    %32 = vector.load %arg10[%c0_31, %c0_32] : memref<1x128xf32, #tpu.memory_space<vmem>>, vector<1x128xf32>
    tpu.vector_store %arg10[%c0_31, %c0_32], %31 {strides = array<i32>} : memref<1x128xf32, #tpu.memory_space<vmem>>, vector<1x128xf32>,
    return
  }
  func.func @transform_0(%arg0: i32) -> (i32, i32) {
    %c0_i32 = arith.constant 0 : i32
    %c0_i32_0 = arith.constant 0 : i32
    return %arg0, %c0_i32 : i32, i32
  }
  func.func @transform_1(%arg0: i32) -> (i32, i32) {
    %c0_i32 = arith.constant 0 : i32
    %c0_i32_0 = arith.constant 0 : i32
    return %arg0, %c0_i32 : i32, i32
  }
  func.func @transform_2(%arg0: i32) -> (i32, i32) {
    %c0_i32 = arith.constant 0 : i32
    %c0_i32_0 = arith.constant 0 : i32
    %c0_i32_1 = arith.constant 0 : i32
    return %c0_i32, %c0_i32_0 : i32, i32
  }
  func.func @transform_3(%arg0: i32) -> (i32, i32) {
    %c0_i32 = arith.constant 0 : i32
    %c0_i32_0 = arith.constant 0 : i32
    %c0_i32_1 = arith.constant 0 : i32
    return %c0_i32, %c0_i32_0 : i32, i32
  }
  func.func @transform_4(%arg0: i32) -> (i32, i32) {
    %c0_i32 = arith.constant 0 : i32
    %c0_i32_0 = arith.constant 0 : i32
    return %arg0, %c0_i32 : i32, i32
  }
  func.func @transform_5(%arg0: i32) -> (i32, i32) {
    %c0_i32 = arith.constant 0 : i32
    %c0_i32_0 = arith.constant 0 : i32
    return %arg0, %c0_i32 : i32, i32
  }
  func.func @transform_6(%arg0: i32) -> (i32, i32) {
    %c0_i32 = arith.constant 0 : i32
    %c0_i32_0 = arith.constant 0 : i32
    %c0_i32_1 = arith.constant 0 : i32
    return %c0_i32, %c0_i32_0 : i32, i32
  }
  func.func @transform_7(%arg0: i32) -> (i32, i32) {
    %c0_i32 = arith.constant 0 : i32
    %c0_i32_0 = arith.constant 0 : i32
    %c0_i32_1 = arith.constant 0 : i32
    return %c0_i32, %c0_i32_0 : i32, i32
  }
  func.func @transform_8(%arg0: i32) -> (i32, i32) {
    %c0_i32 = arith.constant 0 : i32
    %c0_i32_0 = arith.constant 0 : i32
    %c0_i32_1 = arith.constant 0 : i32
    return %c0_i32, %c0_i32_0 : i32, i32
  }
  func.func @transform_9(%arg0: i32) -> (i32, i32) {
    %c0_i32 = arith.constant 0 : i32
    %c0_i32_0 = arith.constant 0 : i32
    %c0_i32_1 = arith.constant 0 : i32
    return %c0_i32, %c0_i32_0 : i32, i32
  }
}

</mosaic_0001>

<bundles_post_ra>
// kernel: tpu_custom_call.1
= control target key start
LH: loop header
LB: loop body
LE: loop exit
PB: predicated region body
PF: predicated region fallthrough
CT: control target
= control target key end

     0   :  { %15 = vsyncpa [#allocation3], 0  ;;  %s1687_s0 = inlined_call_operand.vmem [shape: bf16[128,36], index: 0, kind: input, shape index: {}]   ;;  %s1688_s1 = inlined_call_operand.vmem [shape: bf16[128,4], index: 1, kind: input, shape index: {}]   ;;  %s1689_s2 = inlined_call_operand.vmem [shape: bf16[36,128], index: 2, kind: input, shape index: {}]   ;;  %s1690_s3 = inlined_call_operand.vmem [shape: bf16[4,128], index: 3, kind: input, shape index: {}]   ;;  %s1691_s4 = inlined_call_operand.hbm [shape: f32[128,128], index: 4, kind: output, shape index: {0}]   ;;  %s1692_s5 = inlined_call_operand.hbm [shape: f32[128,128], index: 5, kind: output, shape index: {1}]   ;;  %s1693_s6 = inlined_call_operand.hbm [shape: f32[1,128], index: 6, kind: output, shape index: {2}]   ;;  %s1694_s7 = inlined_call_operand.hbm [shape: f32[1,128], index: 7, kind: output, shape index: {3}]   ;;  %s1695_s8 = inlined_call_operand.hbm [shape: f32[1,128], index: 8, kind: output, shape index: {4}]   ;;  %s1696_s9 = inlined_call_operand.hbm [shape: f32[1,128], index: 9, kind: output, shape index: {5}]  }
   0x1   :  { %17 = vsyncpa [#allocation3 + $0x1], 0 }
   0x2   :  { %18 = vsyncpa [#allocation5], 0 }
   0x3   :  { %20 = vsyncpa [#allocation5 + $0x1], 0 }
   0x4   :  { %21 = vsyncpa [#allocation8], 0 }
   0x5   :  { %22 = vsyncpa [#allocation11], 0  ;;  %s1373_s30 = smov 0   ;;  %s1375_s10 = smov 0  }
   0x6   :  { %s1377_s11 = smov 0   ;;  %s1379_s12 = smov 0  }
   0x7 LB: > { %s1394_s13 = sadd.s32 4294967295, %s1312_s12   ;;  %s1697_s14 = sadd.s32 4294967294, %s1312_s12   ;;  %s1312_s12 = sphi %s1379_s12, %s1710_s12   ;;  %s1308_s11 = sphi %s1377_s11, %s1709_s11   ;;  %s1304_s10 = sphi %s1375_s10, %s1708_s10   ;;  %s1300_s30 = sphi %s1373_s30, %s1707_s30  }
   0x8   : > { %s1398_s15 = sadd.s32 1, %s1312_s12   ;;  %s129_s16 = sadd.s32 1, %s1308_s11 }
   0x9   : > { %s126_s17 = ssub.s32 %s1312_s12, %s1398_s15  ;;  %p139_p0 = scmp.ne.s32.totalorder %s1308_s11, %s1304_s10 }
   0xa   : > { %p127_p1 = scmp.eq.s32.totalorder %s126_s17, 0  ;;  %p140_p2 = scmp.eq.s32.totalorder %s1394_s13, 1 }
   0xb   : > { %p145_p3 = scmp.ne.s32.totalorder %s1304_s10, %s1300_s30  ;;  %p146_p4 = scmp.eq.s32.totalorder %s1697_s14, 1 }
   0xc   : > { %s1411_s18 = scalar_select %p127_p1, %s1308_s11, %s129_s16  }
   0xd   : > { %p1415_p5 = por %p140_p2, %p139_p0  ;;  %p1419_p6 = por %p146_p4, %p145_p3 }
   0xe   : > { %p933_p7 = scmp.ge.s32.totalorder %s1312_s12, 1  ;;  %p298_p8 = scmp.lt.s32.totalorder %s1312_s12, 3 }
  0x10   : > { %p299_p9 = pnand %p933_p7, %p298_p8 }
  0x11   : > { %s1698_s21 = sand.u32 (!%p299_p9), 1, %s1304_s10   ;;  %s936_s22 = sshll.u32 (!%p299_p9), %s1394_s13, 3 }
  0x12   : > { %302 = sbr.rel (%p299_p9) target bundleno = 402 (0x192), region = 36  ;;  %s934_s23 = sshll.u32 (!%p299_p9), %s1698_s21, 6 }
  0x13   : > { %p345_p10 = scmp.lt.s32.totalorder (!%p299_p9), %s936_s22, 15  ;;  %s1439_s17 = scalar_lea.vmem (!%p299_p9), [#allocation2], %s934_s23 }
  0x14   : > { %s1441_s14 = scalar_lea.vmem (!%p299_p9), [#allocation4], %s934_s23  ;;  %p940_p11 = scmp.ne.s32.totalorder (!%p299_p9), %s1394_s13, 0 }
  0x19   : > { %s1712_s22 = smov (!%p345_p10, %s936_s22), 15  ;;  %362 = sbr.rel (%p940_p11) target bundleno = 32 (0x20), region = 40 }
  0x1a   : > { %s937_s24 = sshll.u32 %s1712_s22, 2  ;;  %v1314_v0 = vmov (!%p940_p11), 0.0  }
  0x1b   : > { %s1432_s27 = scalar_lea.vmem %s1687_s0, %s937_s24  ;;  %s1437_s16 = scalar_lea.vmem %s1688_s1, %s937_s24  ;;  %363 = vst [vmem:[#allocation6] sm:$0x1] (!%p940_p11), %v1314_v0  ;;  %364 = vst [vmem:[#allocation7] sm:$0x1] (!%p940_p11), %v1314_v0 }
  0x1c   : > { %365 = vst [vmem:[#allocation9] sm:$0x1] (!%p940_p11), %v1314_v0  ;;  %366 = vst [vmem:[#allocation10] sm:$0x1] (!%p940_p11), %v1314_v0 }
  0x20 PF: > { %vm428_vm0 = vcmask 1041408   ;;  %v553_v1 = vld [vmem:[%s1690_s3] sm:$0x3]  ;;  %vm574_vm1 = vcmask 31744   ;;  %v1093_v5 = vld [vmem:[%s1437_s16 + $0x8] sm:$0xff]   ;;  %v1096_v8 = vld [vmem:[%s1437_s16 + $0x10] sm:$0xff]  }
  0x21   : > { %v1091_v2 = vld [vmem:[%s1689_s2] sm:$0xff]   ;;  %1015 = vmatprep.subr.msk.bf16.mxu1 %vm428_vm0, %v553_v1  ;;  %v588_v3 = vsel %vm428_vm0, %v553_v1, 0  ;;  %v1094_v6 = vld [vmem:[%s1689_s2 + $0x8] sm:$0xff]   ;;  %v1095_v7 = vld [vmem:[%s1689_s2 + $0x10] ss:$0 sps:$4 sm:$0x33]  }
  0x22   : > { %v1092_v4 = vld [vmem:[%s1437_s16] sm:$0xff]   ;;  %1005 = vmatpush3.bf16.msra.mxu1 %v588_v3  ;;  %990 = vmatprep.subr.bf16.mxu0 %v1091_v2  ;;  %vm415_vm2 = vcmask 293888   ;;  %v430_v10 = vsel %vm428_vm0, %v1095_v7, 0  ;;  %v1097_v11 = vld [vmem:[%s1437_s16 + $0x18] sm:$0xff]   ;;  %v1099_v12 = vld [vmem:[%s1432_s27 + $0x8] sm:$0xff]   ;;  %s708_s16 = sand.u32 1, %s1394_s13  }
  0x23   : > { %991 = vmatpush3.bf16.msra.mxu0 %v1091_v2  ;;  %1006 = vmatprep.mubr.msk.bf16.mxu1 %vm574_vm1, %v1092_v4  ;;  %v1098_v9 = vld [vmem:[%s1432_s27] sm:$0xff]   ;;  %v1100_v13 = vld [vmem:[%s1432_s27 + $0x10] sm:$0xff]   ;;  %v1101_v14 = vld [vmem:[%s1432_s27 + $0x18] sm:$0xff]   ;;  %s1699_s27 = sshll.u32 %s1394_s13, 10  ;;  %s738_s25 = sshll.u32 %s1441_s14, 4  ;;  %s1489_s25 = int_to_ptr.vmem [resolvable:$true] %s738_s25 }
  0x24   : > { %992 = vmatprep.subr.bf16.mxu0 %v1094_v6  ;;  %996 = vmatprep.mubr.msk.bf16.mxu0 %vm415_vm2, %v1098_v9  ;;  %s1487_s26 = scalar_lea.hbm %s1692_s5, %s1699_s27  ;;  %s1498_s28 = scalar_lea.sflag [#allocation5], %s708_s16 }
  0x25   : > { %1007 = vmatmul.mubr.msk.bf16.vlgmr.msra.gmra.mrb[0].mxu1 %vm574_vm1, %v1093_v5  ;;  %s1102_s29 = scalar_lea.vmem %s1489_s25, 1024  ;;  %s1315_s22 = smov [#allocation4]  }
  0x26   : > { %1010 = vmatprep.mubr.msk.bf16.mxu1 %vm574_vm1, %v1096_v8  ;;  %p1103_p12 = scmp.ne.s32.totalorder %s1489_s25, %s1102_s29  ;;  %s1106_s24 = sshll.u32 %s1315_s22, 4  ;;  %s1107_s24 = int_to_ptr.vmem [resolvable:$false] %s1106_s24 }
  0x27   : > { %993 = vmatpush3.bf16.msra.mxu0 %v1094_v6  ;;  %p1109_p1 = scmp.lt.s32.totalorder %s1489_s25, %s1107_s24 }
  0x28   : > { %1014 = vmatprep.subr.msk.bf16.mxu0 %vm428_vm0, %v1095_v7  ;;  %p1104_p13 = pnand %p1103_p12, %p1415_p5 }
  0x2a   : > { %p1105_p0 = pneg %p1104_p13 }
  0x2b   : > { %995 = vmatpush3.bf16.msra.mxu0 %v430_v10 }
  0x2d   : > { %1011 = vmatmul.mubr.msk.bf16.gmra.mrb[4].mxu1 %vm574_vm1, %v1097_v11 }
  0x2e   : > { %997 = vmatmul.mubr.msk.bf16.vlgmr.msra.gmra.mrb[0].mxu0 %vm415_vm2, %v1099_v12 }
  0x2f   : > { %1000 = vmatprep.mubr.msk.bf16.mxu0 %vm415_vm2, %v1100_v13 }
  0x36   : > { %1001 = vmatmul.mubr.msk.bf16.gmra.mrb[4].mxu0 %vm415_vm2, %v1101_v14 }
  0xf8   : > { %v1008_v15 = vpop.f32.mrb[0].mxu1 }
  0xf9   : > { %657 = vst [vmem:[%s1441_s14 + $0x10] sm:$0xff] %v1008_v15  ;;  %v624_v16 = vpop.f32.mrb[1].mxu1  ;;  %v682_v20 = vmul.f32 %v1008_v15, %v1008_v15 }
  0xfa   : > { %655 = vst [vmem:[%s1441_s14] sm:$0xff] %v624_v16  ;;  %v680_v17 = vmul.f32 %v624_v16, %v624_v16  ;;  %v1009_v18 = vpop.f32.mrb[2].mxu1 }
  0xfb   : > { %658 = vst [vmem:[%s1441_s14 + $0x18] sm:$0xff] %v1009_v18  ;;  %v627_v19 = vpop.f32.mrb[3].mxu1  ;;  %v683_v23 = vmul.f32 %v1009_v18, %v1009_v18 }
  0xfc   : > { %656 = vst [vmem:[%s1441_s14 + $0x8] sm:$0xff] %v627_v19  ;;  %v664_v21 = vadd.f32 %v627_v19, %v624_v16  ;;  %v681_v22 = vmul.f32 %v627_v19, %v627_v19 }
  0xfe   : > { %v665_v24 = vadd.f32 %v1008_v15, %v664_v21  ;;  %v688_v25 = vadd.f32 %v681_v22, %v680_v17 }
 0x100   : > { %v689_v26 = vadd.f32 %v688_v25, %v682_v20  ;;  %v1012_v27 = vpop.f32.mrb[4].mxu1  ;;  %v666_v28 = vadd.f32 %v1009_v18, %v665_v24 }
 0x101   : > { %661 = vst [vmem:[%s1441_s14 + $0x30] sm:$0xff] %v1012_v27  ;;  %v640_v29 = vpop.f32.mrb[5].mxu1  ;;  %v998_v30 = vpop.f32.mrb[0].mxu0  ;;  %v686_v38 = vmul.f32 %v1012_v27, %v1012_v27 }
 0x102   : > { %659 = vst [vmem:[%s1441_s14 + $0x20] sm:$0xff] %v640_v29  ;;  %v667_v31 = vadd.f32 %v666_v28, %v640_v29  ;;  %v684_v32 = vmul.f32 %v640_v29, %v640_v29  ;;  %v690_v33 = vadd.f32 %v689_v26, %v683_v23  ;;  %499 = vst [vmem:[%s1439_s17 + $0x10] sm:$0xff] %v998_v30  ;;  %v1013_v34 = vpop.f32.mrb[6].mxu1  ;;  %v466_v35 = vpop.f32.mrb[1].mxu0 }
 0x103   : > { %662 = vst [vmem:[%s1441_s14 + $0x38] sm:$0xff] %v1013_v34  ;;  %497 = vst [vmem:[%s1439_s17] sm:$0xff] %v466_v35  ;;  %v643_v36 = vpop.f32.mrb[7].mxu1  ;;  %v999_v37 = vpop.f32.mrb[2].mxu0  ;;  %v522_v43 = vmul.f32 %v466_v35, %v466_v35 }
 0x104   : > { %v691_v39 = vadd.f32 %v690_v33, %v684_v32  ;;  %660 = vst [vmem:[%s1441_s14 + $0x28] sm:$0xff] %v643_v36  ;;  %v668_v40 = vadd.f32 %v667_v31, %v643_v36  ;;  %v685_v41 = vmul.f32 %v643_v36, %v643_v36  ;;  %500 = vst [vmem:[%s1439_s17 + $0x18] sm:$0xff] %v999_v37  ;;  %v469_v42 = vpop.f32.mrb[3].mxu0  ;;  %s1108_s14 = scalar_lea.vmem %s1107_s24, 2048 }
 0x105   : > { %498 = vst [vmem:[%s1439_s17 + $0x8] sm:$0xff] %v469_v42  ;;  %v506_v44 = vadd.f32 %v469_v42, %v466_v35  ;;  %v523_v45 = vmul.f32 %v469_v42, %v469_v42  ;;  %p1110_p3 = scmp.lt.s32.totalorder %s1108_s14, %s1102_s29 }
 0x107   : > { %p1111_p4 = por %p1110_p3, %p1109_p1 }
 0x109   : > { %p1112_p7 = pnand %p1111_p4, %p1105_p0 }
 0x10b   : > { %1115 = shalt.err (!%p1112_p7)
}
 0x10c   : > { %s1116_s16 = scalar_lea.hbm %s1487_s26, 1024  ;;  %s1120_s22 = scalar_lea.hbm %s1692_s5, 2048 }
 0x10d   : > { %p1117_p8 = scmp.ne.s32.totalorder %s1487_s26, %s1116_s16  ;;  %p1121_p11 = scmp.lt.u32.totalorder %s1487_s26, %s1692_s5 }
 0x10e   : > { %p1122_p12 = scmp.lt.u32.totalorder %s1120_s22, %s1116_s16  ;;  %p1124_p0 = scmp.lt.u32.totalorder %s1116_s16, %s1487_s26 }
 0x10f   : > { %p1118_p9 = pnand %p1117_p8, %p1415_p5 }
 0x110   : > { %p1123_p13 = por %p1122_p12, %p1121_p11 }
 0x111   : > { %p1119_p10 = pneg %p1118_p9 }
 0x112   : > { %p1125_p1 = por %p1124_p0, %p1123_p13 }
 0x114   : > { %p1126_p3 = pnand %p1125_p1, %p1119_p10 }
 0x116   : > { %1129 = shalt.err (!%p1126_p3)
}
 0x117   : > { %s1700_s29 = smov 128   ;;  %s1317_s14 = smov 8   ;;  %v687_v46 = vmul.f32 %v1013_v34, %v1013_v34  ;;  %v669_v47 = vadd.f32 %v1012_v27, %v668_v40  ;;  %v692_v48 = vadd.f32 %v691_v39, %v685_v41  ;;  %v524_v49 = vmul.f32 %v998_v30, %v998_v30  ;;  %v1002_v56 = vpop.f32.mrb[4].mxu0 }
 0x118   : > { %1017 = dma.vmem_to_hbm [thread:$0]  (%p1415_p5), %s1489_s25, 1024, %s1487_s26, %s1498_s28, %s1700_s29, %s1700_s29, %s1317_s14   ;;  %v507_v50 = vadd.f32 %v998_v30, %v506_v44  ;;  %v530_v51 = vadd.f32 %v523_v45, %v522_v43  ;;  %v525_v54 = vmul.f32 %v999_v37, %v999_v37  ;;  %v482_v60 = vpop.f32.mrb[5].mxu0 }
 0x119   : > { %v670_v52 = vadd.f32 %v1013_v34, %v669_v47  ;;  %v693_v53 = vadd.f32 %v692_v48, %v686_v38  ;;  %s722_s21 = sshll.u32 %s1439_s17, 4  ;;  %503 = vst [vmem:[%s1439_s17 + $0x30] sm:$0xff] %v1002_v56  ;;  %501 = vst [vmem:[%s1439_s17 + $0x20] sm:$0xff] %v482_v60  ;;  %v526_v62 = vmul.f32 %v482_v60, %v482_v60  ;;  %v1003_v0 = vpop.f32.mrb[6].mxu0  ;;  %s1703_s27 = sshll.u32 %s1394_s13, 10  ;;  %s1535_s21 = int_to_ptr.vmem [resolvable:$true] %s722_s21 }
 0x11a   : > { %v531_v55 = vadd.f32 %v530_v51, %v524_v49  ;;  %v508_v57 = vadd.f32 %v999_v37, %v507_v50  ;;  %s1533_s28 = scalar_lea.hbm %s1691_s4, %s1703_s27  ;;  %504 = vst [vmem:[%s1439_s17 + $0x38] sm:$0xff] %v1003_v0  ;;  %v485_v3 = vpop.f32.mrb[7].mxu0  ;;  %s1704_s16 = sand.u32 1, %s1304_s10  }
 0x11b   : > { %v671_v58 = vrot.slane %v670_v52, 4  ;;  %v694_v59 = vadd.f32 %v693_v53, %v687_v46  ;;  %502 = vst [vmem:[%s1439_s17 + $0x28] sm:$0xff] %v485_v3  ;;  %v527_v6 = vmul.f32 %v485_v3, %v485_v3  ;;  %s1541_s23 = scalar_lea.sflag [#allocation3], %s1704_s16  ;;  %s1130_s22 = scalar_lea.vmem %s1535_s21, 1024 }
 0x11c   : > { %v509_v61 = vadd.f32 %v508_v57, %v482_v60  ;;  %v532_v63 = vadd.f32 %v531_v55, %v525_v54  ;;  %p1131_p4 = scmp.ne.s32.totalorder %s1535_s21, %s1130_s22  ;;  %s1318_s24 = smov [#allocation2]  }
 0x11d   : > { %v672_v1 = vadd.f32 %v671_v58, %v670_v52  ;;  %v695_v2 = vrot.slane %v694_v59, 4  ;;  %s1134_s27 = sshll.u32 %s1318_s24, 4  ;;  %s1135_s27 = int_to_ptr.vmem [resolvable:$false] %s1134_s27 }
 0x11e   : > { %v533_v4 = vadd.f32 %v532_v63, %v526_v62  ;;  %v510_v5 = vadd.f32 %v509_v61, %v485_v3  ;;  %p1132_p7 = pnand %p1131_p4, %p1415_p5  ;;  %s1136_s25 = scalar_lea.vmem %s1135_s27, 2048 }
 0x11f   : > { %p1137_p9 = scmp.lt.s32.totalorder %s1535_s21, %s1135_s27  ;;  %p1138_p10 = scmp.lt.s32.totalorder %s1136_s25, %s1130_s22 }
 0x120   : > { %p1133_p8 = pneg %p1132_p7 }
 0x121   : > { %p1139_p11 = por %p1138_p10, %p1137_p9 }
 0x123   : > { %p1140_p12 = pnand %p1139_p11, %p1133_p8 }
 0x125   : > { %1143 = shalt.err (!%p1140_p12)
}
 0x126   : > { %s1144_s17 = scalar_lea.hbm %s1533_s28, 1024  ;;  %s1148_s24 = scalar_lea.hbm %s1691_s4, 2048 }
 0x127   : > { %p1145_p13 = scmp.ne.s32.totalorder %s1533_s28, %s1144_s17  ;;  %p1149_p3 = scmp.lt.u32.totalorder %s1533_s28, %s1691_s4 }
 0x128   : > { %p1150_p4 = scmp.lt.u32.totalorder %s1148_s24, %s1144_s17  ;;  %p1152_p8 = scmp.lt.u32.totalorder %s1144_s17, %s1533_s28 }
 0x129   : > { %p1146_p0 = pnand %p1145_p13, %p1415_p5 }
 0x12a   : > { %p1151_p7 = por %p1150_p4, %p1149_p3 }
 0x12b   : > { %p1147_p1 = pneg %p1146_p0 }
 0x12c   : > { %p1153_p9 = por %p1152_p8, %p1151_p7 }
 0x12e   : > { %p1154_p10 = pnand %p1153_p9, %p1147_p1 }
 0x130   : > { %1157 = shalt.err (!%p1154_p10)
}
 0x131   : > { %s1705_s22 = smov 128   ;;  %v673_v7 = vrot.slane %v672_v1, 2  ;;  %v696_v8 = vadd.f32 %v695_v2, %v694_v59  ;;  %v528_v9 = vmul.f32 %v1002_v56, %v1002_v56  ;;  %v511_v10 = vadd.f32 %v1002_v56, %v510_v5  ;;  %v663_v21 = vld [vmem:[#allocation9] sm:$0x1]  ;;  %v679_v26 = vld [vmem:[#allocation10] sm:$0x1] }
 0x132   : > { %1016 = dma.vmem_to_hbm [thread:$0]  (%p1415_p5), %s1535_s21, 1024, %s1533_s28, %s1541_s23, %s1705_s22, %s1705_s22, %s1317_s14   ;;  %v534_v11 = vadd.f32 %v533_v4, %v527_v6  ;;  %v529_v14 = vmul.f32 %v1003_v0, %v1003_v0 }
 0x133   : > { %v674_v12 = vadd.f32 %v673_v7, %v672_v1  ;;  %v697_v13 = vrot.slane %v696_v8, 2  ;;  %v512_v15 = vadd.f32 %v1003_v0, %v511_v10  ;;  %s1319_s19 = smov [#allocation10]  }
 0x134   : > { %v535_v16 = vadd.f32 %v534_v11, %v528_v9  ;;  %s785_s29 = sshll.u32 %s1319_s19, 4  ;;  %s786_s29 = int_to_ptr.vmem [resolvable:$true] %s785_s29 }
 0x135   : > { %v675_v17 = vrot.slane %v674_v12, 1  ;;  %v698_v18 = vadd.f32 %v697_v13, %v696_v8  ;;  %v513_v19 = vrot.slane %v512_v15, 4  ;;  %s1158_s14 = scalar_lea.vmem %s786_s29, 16  ;;  %s1164_s21 = scalar_lea.vmem %s786_s29, 32 }
 0x136   : > { %v536_v20 = vadd.f32 %v535_v16, %v529_v14  ;;  %p1159_p5 = scmp.ne.s32.totalorder %s786_s29, %s1158_s14  ;;  %p1165_p13 = scmp.lt.s32.totalorder %s786_s29, %s786_s29 }
 0x137   : > { %v676_v22 = vadd.f32 %v675_v17, %v674_v12  ;;  %v699_v23 = vrot.slane %v698_v18, 1  ;;  %v514_v24 = vadd.f32 %v513_v19, %v512_v15  ;;  %p1166_p0 = scmp.lt.s32.totalorder %s1164_s21, %s1158_s14 }
 0x138   : > { %v537_v25 = vrot.slane %v536_v20, 4  ;;  %p1160_p11 = pnand %p1159_p5, %p140_p2 }
 0x139   : > { %v677_v27 = vadd.f32 %v676_v22, %v663_v21  ;;  %v700_v28 = vadd.f32 %v699_v23, %v698_v18  ;;  %v515_v30 = vrot.slane %v514_v24, 2  ;;  %p1167_p1 = por %p1166_p0, %p1165_p13 }
 0x13a   : > { %v538_v29 = vadd.f32 %v537_v25, %v536_v20  ;;  %p1161_p12 = pneg %p1160_p11 }
 0x13b   : > { %678 = vst [vmem:[#allocation9] sm:$0x1] %v677_v27  ;;  %v701_v31 = vadd.f32 %v700_v28, %v679_v26  ;;  %v516_v33 = vadd.f32 %v515_v30, %v514_v24 }
 0x13c   : > { %v539_v32 = vrot.slane %v538_v29, 2  ;;  %p1168_p3 = pnand %p1167_p1, %p1161_p12 }
 0x13d   : > { %702 = vst [vmem:[#allocation10] sm:$0x1] %v701_v31  ;;  %v517_v35 = vrot.slane %v516_v33, 1 }
 0x13e   : > { %v540_v34 = vadd.f32 %v539_v32, %v538_v29 }
 0x13f   : > { %1171 = shalt.err (!%p1168_p3)
}
 0x140   : > { %s1172_s25 = scalar_lea.hbm %s1696_s9, 16 }
 0x141   : > { %p1173_p4 = scmp.ne.s32.totalorder %s1696_s9, %s1172_s25  ;;  %p1178_p9 = scmp.lt.u32.totalorder %s1172_s25, %s1696_s9 }
 0x143   : > { %p1174_p7 = pnand %p1173_p4, %p140_p2 }
 0x145   : > { %p1175_p8 = pneg %p1174_p7 }
 0x147   : > { %p1180_p10 = pnand %p1178_p9, %p1175_p8 }
 0x149   : > { %1183 = shalt.err (!%p1180_p10)
}
 0x14a   : > { %1025 = dma.vmem_to_hbm [thread:$0]  (%p140_p2), %s786_s29, 16, %s1696_s9, [#allocation11]   ;;  %v505_v36 = vld [vmem:[#allocation6] sm:$0x1]  ;;  %v541_v37 = vrot.slane %v540_v34, 1  ;;  %v518_v38 = vadd.f32 %v517_v35, %v516_v33 }
 0x14b   : > { %s1320_s19 = smov [#allocation6]   ;;  %v521_v39 = vld [vmem:[#allocation7] sm:$0x1]  ;;  %s1321_s21 = smov [#allocation7]  }
 0x14c   : > { %s752_s14 = sshll.u32 %s1320_s19, 4  ;;  %s763_s28 = sshll.u32 %s1321_s21, 4  ;;  %v542_v40 = vadd.f32 %v541_v37, %v540_v34  ;;  %v519_v41 = vadd.f32 %v518_v38, %v505_v36  ;;  %s753_s14 = int_to_ptr.vmem [resolvable:$true] %s752_s14  ;;  %s1586_s28 = int_to_ptr.vmem [resolvable:$true] %s763_s28 }
 0x14d   : > { %s1322_s23 = smov [#allocation9]   ;;  %s1184_s29 = scalar_lea.vmem %s753_s14, 16 }
 0x14e   : > { %s774_s17 = sshll.u32 %s1322_s23, 4  ;;  %v543_v42 = vadd.f32 %v542_v40, %v521_v39  ;;  %520 = vst [vmem:[#allocation6] sm:$0x1] %v519_v41  ;;  %p1185_p5 = scmp.ne.s32.totalorder %s753_s14, %s1184_s29  ;;  %s1588_s17 = int_to_ptr.vmem [resolvable:$true] %s774_s17 }
 0x14f   : > { %s1190_s25 = scalar_lea.vmem %s753_s14, 32  ;;  %p1191_p13 = scmp.lt.s32.totalorder %s753_s14, %s753_s14 }
 0x150   : > { %p1186_p11 = pnand %p1185_p5, %p140_p2  ;;  %p1192_p0 = scmp.lt.s32.totalorder %s1190_s25, %s1184_s29 }
 0x152   : > { %p1187_p12 = pneg %p1186_p11  ;;  %p1193_p1 = por %p1192_p0, %p1191_p13 }
 0x154   : > { %p1194_p3 = pnand %p1193_p1, %p1187_p12 }
 0x156   : > { %1197 = shalt.err (!%p1194_p3)
}
 0x157   : > { %s1198_s24 = scalar_lea.hbm %s1693_s6, 16 }
 0x158   : > { %p1199_p4 = scmp.ne.s32.totalorder %s1693_s6, %s1198_s24  ;;  %p1204_p9 = scmp.lt.u32.totalorder %s1198_s24, %s1693_s6 }
 0x15a   : > { %p1200_p7 = pnand %p1199_p4, %p140_p2 }
 0x15c   : > { %p1201_p8 = pneg %p1200_p7 }
 0x15e   : > { %p1206_p10 = pnand %p1204_p9, %p1201_p8 }
 0x160   : > { %1209 = shalt.err (!%p1206_p10)
}
 0x161   : > { %1019 = dma.vmem_to_hbm [thread:$0]  (%p140_p2), %s753_s14, 16, %s1693_s6, [#allocation5]   ;;  %544 = vst [vmem:[#allocation7] sm:$0x1] %v543_v42 }
 0x162   : > { %s1210_s25 = scalar_lea.vmem %s1586_s28, 16  ;;  %s1216_s26 = scalar_lea.vmem %s1586_s28, 32 }
 0x163   : > { %p1211_p5 = scmp.ne.s32.totalorder %s1586_s28, %s1210_s25  ;;  %p1217_p13 = scmp.lt.s32.totalorder %s1586_s28, %s1586_s28 }
 0x164   : > { %p1218_p0 = scmp.lt.s32.totalorder %s1216_s26, %s1210_s25 }
 0x165   : > { %p1212_p11 = pnand %p1211_p5, %p140_p2 }
 0x166   : > { %p1219_p1 = por %p1218_p0, %p1217_p13 }
 0x167   : > { %p1213_p12 = pneg %p1212_p11 }
 0x169   : > { %p1220_p3 = pnand %p1219_p1, %p1213_p12 }
 0x16b   : > { %1223 = shalt.err (!%p1220_p3)
}
 0x16c   : > { %s1224_s27 = scalar_lea.hbm %s1694_s7, 16 }
 0x16d   : > { %p1225_p4 = scmp.ne.s32.totalorder %s1694_s7, %s1224_s27  ;;  %p1230_p9 = scmp.lt.u32.totalorder %s1224_s27, %s1694_s7 }
 0x16f   : > { %p1226_p7 = pnand %p1225_p4, %p140_p2 }
 0x171   : > { %p1227_p8 = pneg %p1226_p7 }
 0x173   : > { %p1232_p10 = pnand %p1230_p9, %p1227_p8 }
 0x175   : > { %1235 = shalt.err (!%p1232_p10)
}
 0x176   : > { %1021 = dma.vmem_to_hbm [thread:$0]  (%p140_p2), %s1586_s28, 16, %s1694_s7, [#allocation8]  }
 0x177   : > { %s1236_s25 = scalar_lea.vmem %s1588_s17, 16  ;;  %s1242_s26 = scalar_lea.vmem %s1588_s17, 32 }
 0x178   : > { %p1237_p5 = scmp.ne.s32.totalorder %s1588_s17, %s1236_s25  ;;  %p1243_p13 = scmp.lt.s32.totalorder %s1588_s17, %s1588_s17 }
 0x179   : > { %p1244_p0 = scmp.lt.s32.totalorder %s1242_s26, %s1236_s25 }
 0x17a   : > { %p1238_p11 = pnand %p1237_p5, %p140_p2 }
 0x17b   : > { %p1245_p1 = por %p1244_p0, %p1243_p13 }
 0x17c   : > { %p1239_p12 = pneg %p1238_p11 }
 0x17e   : > { %p1246_p3 = pnand %p1245_p1, %p1239_p12 }
 0x180   : > { %1249 = shalt.err (!%p1246_p3)
}
 0x181   : > { %s1250_s27 = scalar_lea.hbm %s1695_s8, 16 }
 0x182   : > { %p1251_p4 = scmp.ne.s32.totalorder %s1695_s8, %s1250_s27  ;;  %p1256_p9 = scmp.lt.u32.totalorder %s1250_s27, %s1695_s8 }
 0x184   : > { %p1252_p7 = pnand %p1251_p4, %p140_p2 }
 0x186   : > { %p1253_p8 = pneg %p1252_p7 }
 0x188   : > { %p1258_p10 = pnand %p1256_p9, %p1253_p8 }
 0x18a   : > { %1261 = shalt.err (!%p1258_p10)
}
 0x18b   : > { %1023 = dma.vmem_to_hbm [thread:$0]  (%p140_p2), %s1588_s17, 16, %s1695_s8, [#allocation8]  }
 0x18c   : > { %1279 = dma.done.wait (%p140_p2), [#allocation5], 16  }
 0x18d   : > { %1281 = vsyncadd (%p140_p2), [#allocation5], 4294967280 }
 0x18e   : > { %1283 = dma.done.wait (%p140_p2), [#allocation8], 32  }
 0x18f   : > { %1285 = vsyncadd (%p140_p2), [#allocation8], 4294967264 }
 0x190   : > { %1287 = dma.done.wait (%p140_p2), [#allocation11], 16  }
 0x191   : > { %1289 = vsyncadd (%p140_p2), [#allocation11], 4294967280 }
 0x192 PF: > { %p1051_p5 = scmp.ge.s32.totalorder %s1312_s12, 2  ;;  %s813_s17 = sand.u32 1, %s1300_s30  }
 0x193   : > { %s814_s29 = scalar_lea.sflag [#allocation3], %s813_s17 }
 0x194   : > { %p1037_p11 = pnand %p1051_p5, %p1419_p6 }
 0x196   : > { %1291 = dma.done.wait (!%p1037_p11), %s814_s29, 1024  }
 0x197   : > { %1293 = vsyncadd (!%p1037_p11), %s814_s29, 4294966272  ;;  %s1706_s25 = sadd.s32 4294967294, %s1312_s12  }
 0x198   : > { %s822_s26 = sand.u32 1, %s1706_s25  }
 0x199   : > { %s823_s16 = scalar_lea.sflag [#allocation5], %s822_s26 }
 0x19a   : > { %1295 = dma.done.wait (!%p1037_p11), %s823_s16, 1024  }
 0x19b   : > { %1297 = vsyncadd (!%p1037_p11), %s823_s16, 4294966272  ;;  %p25_p2 = scmp.ge.s32.totalorder %s1398_s15, 4   ;;  %s1707_s30 = smov %s1304_s10 }
 0x19c   : > { %s1708_s10 = smov %s1308_s11  ;;  %s1709_s11 = smov %s1411_s18 }
 0x19d   : > { %s1710_s12 = smov %s1398_s15  ;;  %27 = sbr.rel (!%p25_p2) target bundleno = 7 (0x7), region = 127 }
 0x1a4   :  { %828 = vsyncpa [#allocation3], 1 }
 0x1a5   :  { %830 = vsyncpa [#allocation3 + $0x1], 1 }
 0x1a6   :  { %831 = vsyncpa [#allocation5], 1 }
 0x1a7   :  { %833 = vsyncpa [#allocation5 + $0x1], 1 }
 0x1a8   :  { %834 = vsyncpa [#allocation8], 1 }
 0x1a9   :  { %835 = vsyncpa [#allocation11], 1 }

</bundles_post_ra>
